<compile_context>
chip_gen: v7x
topology: tpu7x:2x2x1
jax: 0.10.0
libtpu: 0.0.40
codegen_flags: <defaults>
</compile_context>

<pallas_src>
import functools
import math

import jax
import jax.numpy as jnp
from jax.experimental import pallas as pl
from jax.experimental.pallas import tpu as pltpu


# --------------------------------------------------------------------------------------
# Small helpers.
# --------------------------------------------------------------------------------------
def _round_up(x, m):
    return (x + m - 1) // m * m


def _pad_dim(d):
    """Smallest value >= d of the form 2^k or 3*2^k (keeps 128-alignment cheap)."""
    p = 1
    while p < d:
        p *= 2
    three_q = 3 * (p // 4)
    return three_q if (p >= 4 and three_q >= d) else p


def _maybe_pad_dim(d):
    """Pad only when the minimal 128-aligned slab for d would be pathologically wide."""
    odd = d
    while odd % 2 == 0:
        odd //= 2
    if d % 128 == 0 or odd <= 3:
        return d
    return _pad_dim(d)


# --------------------------------------------------------------------------------------
# Kernel.  Refs for one grid step (feature block f, batch block b):
#   x_ref: (Bb, fb*d_in)   w_ref: (fb, d_in, d_out)   [b_ref: (1, fb*d_out)]
#   o_ref: (Bb, fb*d_out)  [wd_ref: (fb*d_in, fb*d_out) block-diagonal scratch]
# --------------------------------------------------------------------------------------
def _nlinear_kernel(*refs, fb, d_in, d_out, has_bias, use_diag):
    i = 0
    x_ref = refs[i]; i += 1
    w_ref = refs[i]; i += 1
    b_ref = None
    if has_bias:
        b_ref = refs[i]; i += 1
    o_ref = refs[i]; i += 1
    wd_ref = refs[i] if use_diag else None

    if use_diag:
        # Rebuild the block-diagonal weight once per feature block (the batch axis is
        # the inner grid axis, so program_id(1)==0 holds on every core's first step of
        # a feature block -> megacore safe).  Off-diagonal zeros persist in scratch.
        @pl.when(pl.program_id(1) == 0)
        def _build_block_diag():
            wd_ref[...] = jnp.zeros_like(wd_ref)
            for j in range(fb):  # static, fb is capped by the block chooser
                wd_ref[j * d_in:(j + 1) * d_in, j * d_out:(j + 1) * d_out] = w_ref[j]
        rhs = wd_ref[...]
    else:
        rhs = w_ref[0]                                   # fb == 1: plain matmul

    acc = jnp.dot(x_ref[...], rhs, preferred_element_type=jnp.float32)
    if has_bias:
        acc = acc + b_ref[...].astype(jnp.float32)       # one full-width broadcast add
    o_ref[...] = acc.astype(o_ref.dtype)                 # one full-width lane-dense store


# --------------------------------------------------------------------------------------
# Block-size selection with TPU-padded VMEM accounting.
# --------------------------------------------------------------------------------------
def _choose_blocks(B, F, d_in_p, d_out_p, cbytes, obytes, has_bias, *,
                   lane_target=512, unroll_cap=64, max_batch_block=512,
                   vmem_budget_bytes=20 * 1024 * 1024):
    # fb must be a multiple of fb_base so fb*d_in_p and fb*d_out_p are 128-aligned
    # (unless fb == F, the "block equals full array" escape).
    r_in = 128 // math.gcd(d_in_p, 128)
    r_out = 128 // math.gcd(d_out_p, 128)
    fb_base = r_in * r_out // math.gcd(r_in, r_out)           # power of two <= 128

    max_fb = max(fb_base, min(max(fb_base, lane_target // max(d_in_p, d_out_p)),
                              unroll_cap))
    fb = max(fb_base, (max_fb // fb_base) * fb_base)
    if fb >= F:
        fb = F                                                 # single feature block

    def footprint(bb, fb_):
        # Padded VMEM layout: rows -> sublanes, last dim -> 128 lanes, x2 double buffer.
        lane_in = _round_up(fb_ * d_in_p, 128)
        lane_out = _round_up(fb_ * d_out_p, 128)
        rows = _round_up(bb, 16)
        x_blk = rows * lane_in * cbytes
        o_blk = rows * lane_out * obytes
        w_blk = fb_ * _round_up(d_in_p, 16) * _round_up(d_out_p, 128) * cbytes
        b_blk = 16 * lane_out * cbytes if has_bias else 0
        diag = _round_up(fb_ * d_in_p, 16) * lane_out * cbytes if fb_ > 1 else 0
        return 2 * (x_blk + o_blk + w_blk + b_blk) + diag

    Bb = B if B <= max_batch_block else max(8, (max_batch_block // 8) * 8)
    while footprint(Bb, fb) > vmem_budget_bytes:
        if Bb > 16:
            Bb = max(8, ((Bb // 2) // 8) * 8)                  # shrink batch block first
        elif fb > fb_base and fb > 1:
            fb = max(fb_base, ((fb // 2) // fb_base) * fb_base)
        else:
            break                                              # vmem_limit still has headroom

    F_p = F if fb == F else _round_up(F, fb)
    B_p = B if Bb == B else _round_up(B, Bb)
    return fb, F_p, Bb, B_p


# --------------------------------------------------------------------------------------
# Wrapper.
# --------------------------------------------------------------------------------------
def nlinear(x, weight, bias=None, *, compute_dtype=jnp.bfloat16, out_dtype=None,
            max_batch_block=512, lane_target=512,
            vmem_budget_bytes=20 * 1024 * 1024, vmem_limit_bytes=40 * 1024 * 1024):
    """x: (B, F, d_in); weight: (F, d_in, d_out); bias: (F, d_out) or None.

    compute_dtype: dtype of the data path (default bf16, f32 accumulation).  Pass
    None to keep x.dtype, or pass bf16 tensors to avoid any wrapper-side cast.
    """
    assert x.ndim == 3
    B, F, d_in = x.shape
    F_w, d_in_w, d_out = weight.shape
    assert F_w == F and d_in_w == d_in
    if bias is not None:
        assert bias.shape == (F, d_out)

    out_dtype = x.dtype if out_dtype is None else out_dtype
    cdtype = jnp.dtype(x.dtype if compute_dtype is None else compute_dtype)
    has_bias = bias is not None

    d_in_p = _maybe_pad_dim(d_in)
    d_out_p = _maybe_pad_dim(d_out)
    fb, F_p, Bb, B_p = _choose_blocks(
        B, F, d_in_p, d_out_p, cdtype.itemsize, jnp.dtype(out_dtype).itemsize,
        has_bias, lane_target=lane_target, max_batch_block=max_batch_block,
        vmem_budget_bytes=vmem_budget_bytes)

    # Cast to the compute dtype and zero-pad (zeros do not change the result; padded
    # outputs are sliced off).  Reshapes below are free row-major views.
    xc = x.astype(cdtype)
    wc = weight.astype(cdtype)
    bc = bias.astype(cdtype) if has_bias else None
    if (B_p, F_p, d_in_p) != (B, F, d_in):
        xc = jnp.pad(xc, ((0, B_p - B), (0, F_p - F), (0, d_in_p - d_in)))
    if (F_p, d_in_p, d_out_p) != (F, d_in, d_out):
        wc = jnp.pad(wc, ((0, F_p - F), (0, d_in_p - d_in), (0, d_out_p - d_out)))
    if has_bias and (F_p, d_out_p) != (F, d_out):
        bc = jnp.pad(bc, ((0, F_p - F), (0, d_out_p - d_out)))

    x_flat = xc.reshape(B_p, F_p * d_in_p)

    args = [x_flat, wc]
    in_specs = [
        pl.BlockSpec((Bb, fb * d_in_p), lambda f, b: (b, f)),          # activations
        pl.BlockSpec((fb, d_in_p, d_out_p), lambda f, b: (f, 0, 0)),   # weights (batch-resident)
    ]
    if has_bias:
        args.append(bc.reshape(1, F_p * d_out_p))
        in_specs.append(pl.BlockSpec((1, fb * d_out_p), lambda f, b: (0, f)))

    use_diag = fb > 1
    scratch_shapes = ([pltpu.VMEM((fb * d_in_p, fb * d_out_p), cdtype)]
                      if use_diag else [])

    kernel = functools.partial(_nlinear_kernel, fb=fb, d_in=d_in_p, d_out=d_out_p,
                               has_bias=has_bias, use_diag=use_diag)

    grid = (F_p // fb, B_p // Bb)          # feature axis "parallel" (leading), batch inner

    cbytes = cdtype.itemsize
    obytes = jnp.dtype(out_dtype).itemsize
    bytes_accessed = (B_p * F_p * d_in_p * cbytes + F_p * d_in_p * d_out_p * cbytes
                      + B_p * F_p * d_out_p * obytes
                      + (F_p * d_out_p * cbytes if has_bias else 0))
    flops = 2 * B_p * F_p * fb * d_in_p * d_out_p        # actual block-diagonal MXU flops
    cost = pl.CostEstimate(flops=int(flops), transcendentals=0,
                           bytes_accessed=int(bytes_accessed))

    out_flat = pl.pallas_call(
        kernel,
        out_shape=jax.ShapeDtypeStruct((B_p, F_p * d_out_p), out_dtype),
        grid_spec=pltpu.PrefetchScalarGridSpec(
            num_scalar_prefetch=0,
            grid=grid,
            in_specs=in_specs,
            out_specs=pl.BlockSpec((Bb, fb * d_out_p), lambda f, b: (b, f)),
            scratch_shapes=scratch_shapes,
        ),
        compiler_params=pltpu.CompilerParams(
            dimension_semantics=("parallel", "arbitrary"),
            vmem_limit_bytes=vmem_limit_bytes,
        ),
        cost_estimate=cost,
    )(*args)

    out = out_flat.reshape(B_p, F_p, d_out_p)
    if (B_p, F_p, d_out_p) != (B, F, d_out):
        out = out[:B, :F, :d_out]
    return out


# --------------------------------------------------------------------------------------
# Reference / init helpers.
# --------------------------------------------------------------------------------------
def init_nlinear_params(key, n_features, d_in, d_out, dtype=jnp.float32):
    """Mimics nn.Linear default init per feature: U(-1/sqrt(d_in), 1/sqrt(d_in))."""
    kw, kb = jax.random.split(key)
    bound = 1.0 / math.sqrt(d_in)
    weight = jax.random.uniform(
        kw, (n_features, d_in, d_out), minval=-bound, maxval=bound, dtype=dtype)
    bias = jax.random.uniform(
        kb, (n_features, d_out), minval=-bound, maxval=bound, dtype=dtype)
    return weight, bias


def nlinear_ref(x, weight, bias):
    out = (x[..., None] * weight[None]).sum(-2)
    if bias is not None:
        out = out + bias[None]
    return out


def _bf16_ref(x, w, b):
    f32 = jnp.float32
    return nlinear_ref(x.astype(jnp.bfloat16).astype(f32),
                       w.astype(jnp.bfloat16).astype(f32),
                       None if b is None else b.astype(jnp.bfloat16).astype(f32))


if __name__ == "__main__":
    key = jax.random.PRNGKey(0)
    k1, k2, k3, k4, k5, k6 = jax.random.split(key, 6)

    # Case 1: tiny shapes, single grid step (fb == F), bias, default bf16 data path.
    B, F, D_IN, D_OUT = 8, 4, 16, 32
    x = jax.random.normal(k1, (B, F, D_IN), dtype=jnp.float32)
    w, b = init_nlinear_params(k2, F, D_IN, D_OUT)
    out = jax.block_until_ready(nlinear(x, w, b))
    assert out.shape == (B, F, D_OUT) and out.dtype == x.dtype
    assert jnp.allclose(out, _bf16_ref(x, w, b), atol=1e-3, rtol=1e-3)

    # Case 1b: bias=None and pure-f32 data path (compute_dtype=None) — tight check.
    out_f32 = jax.block_until_ready(nlinear(x, w, None, compute_dtype=None))
    assert jnp.allclose(out_f32, nlinear_ref(x, w, None), atol=1e-4, rtol=1e-4)

    # Case 2: multiple feature blocks (fb < F) -> block-diagonal fused matmul path.
    B2, F2, D_IN2, D_OUT2 = 32, 32, 32, 16
    x2 = jax.random.normal(k3, (B2, F2, D_IN2), dtype=jnp.float32)
    w2, b2 = init_nlinear_params(k4, F2, D_IN2, D_OUT2)
    out2 = jax.block_until_ready(nlinear(x2, w2, b2))
    assert out2.shape == (B2, F2, D_OUT2)
    assert jnp.allclose(out2, _bf16_ref(x2, w2, b2), atol=1e-3, rtol=1e-3)

    # Case 3: also tile the batch axis (2x2 grid) -> scratch reuse across batch blocks.
    out3 = jax.block_until_ready(nlinear(x2, w2, b2, max_batch_block=16))
    assert jnp.allclose(out3, _bf16_ref(x2, w2, b2), atol=1e-3, rtol=1e-3)

    # Case 4: awkward d_out (10 -> padded to 12), odd F -> padding path + output slice.
    B4, F4, D_IN4, D_OUT4 = 8, 5, 16, 10
    x4 = jax.random.normal(k5, (B4, F4, D_IN4), dtype=jnp.float32)
    w4, b4 = init_nlinear_params(k6, F4, D_IN4, D_OUT4)
    out4 = jax.block_until_ready(nlinear(x4, w4, b4))
    assert out4.shape == (B4, F4, D_OUT4)
    assert jnp.allclose(out4, _bf16_ref(x4, w4, b4), atol=1e-3, rtol=1e-3)

    print("KERNEL_OK")
</pallas_src>

<mosaic_0001>
module attributes {stable_mosaic.version = 11 : i64} {
  func.func @_nlinear_kernel(%arg0: i32, %arg1: i32, %arg2: memref<8x64xbf16, #tpu.memory_space<vmem>>, %arg3: memref<4x16x32xbf16, #tpu.memory_space<vmem>>, %arg4: memref<1x128xbf16, #tpu.memory_space<vmem>>, %arg5: memref<8x128xf32, #tpu.memory_space<vmem>>, %arg6: memref<64x128xbf16, #tpu.memory_space<vmem>>) attributes {dimension_semantics = [#tpu.dimension_semantics<parallel>, #tpu.dimension_semantics<arbitrary>], iteration_bounds = array<i64: 1, 1>, scalar_prefetch = 0 : i64, scratch_operands = 1 : i64, tpu.core_type = #tpu.core_type<tc>, window_params = [{transform_indices = @transform_0, window_bounds = array<i64: 8, 64>}, {transform_indices = @transform_1, window_bounds = array<i64: 4, 16, 32>}, {transform_indices = @transform_2, window_bounds = array<i64: 1, 128>}, {transform_indices = @transform_3, window_bounds = array<i64: 8, 128>}]} {
    %c0_i32 = arith.constant 0 : i32
    %0 = arith.cmpi eq, %arg1, %c0_i32 : i32
    %1 = arith.extui %0 : i1 to i32
    %c0_i32_0 = arith.constant 0 : i32
    %2 = arith.cmpi ne, %1, %c0_i32_0 : i32
    scf.if %2 {
      %cst_8 = arith.constant 0.000000e+00 : bf16
      %11 = vector.broadcast %cst_8 : bf16 to vector<64x128xbf16>
      %c0_9 = arith.constant 0 : index
      %c0_10 = arith.constant 0 : index
      %12 = vector.load %arg6[%c0_9, %c0_10] : memref<64x128xbf16, #tpu.memory_space<vmem>>, vector<64x128xbf16>
      tpu.vector_store %arg6[%c0_9, %c0_10], %11 {strides = array<i32>} : memref<64x128xbf16, #tpu.memory_space<vmem>>, vector<64x128xbf16>,
      %c0_11 = arith.constant 0 : index
      %c0_12 = arith.constant 0 : index
      %c0_13 = arith.constant 0 : index
      %13 = vector.load %arg3[%c0_11, %c0_12, %c0_13] : memref<4x16x32xbf16, #tpu.memory_space<vmem>>, vector<1x16x32xbf16>
      %14 = vector.shape_cast %13 : vector<1x16x32xbf16> to vector<16x32xbf16>
      %c0_14 = arith.constant 0 : index
      %c0_15 = arith.constant 0 : index
      %15 = vector.load %arg6[%c0_14, %c0_15] : memref<64x128xbf16, #tpu.memory_space<vmem>>, vector<16x32xbf16>
      tpu.vector_store %arg6[%c0_14, %c0_15], %14 {strides = array<i32>} : memref<64x128xbf16, #tpu.memory_space<vmem>>, vector<16x32xbf16>,
      %c1 = arith.constant 1 : index
      %c0_16 = arith.constant 0 : index
      %c0_17 = arith.constant 0 : index
      %16 = vector.load %arg3[%c1, %c0_16, %c0_17] : memref<4x16x32xbf16, #tpu.memory_space<vmem>>, vector<1x16x32xbf16>
      %17 = vector.shape_cast %16 : vector<1x16x32xbf16> to vector<16x32xbf16>
      %c16 = arith.constant 16 : index
      %c32 = arith.constant 32 : index
      %18 = vector.load %arg6[%c16, %c32] : memref<64x128xbf16, #tpu.memory_space<vmem>>, vector<16x32xbf16>
      tpu.vector_store %arg6[%c16, %c32], %17 {strides = array<i32>} : memref<64x128xbf16, #tpu.memory_space<vmem>>, vector<16x32xbf16>,
      %c2 = arith.constant 2 : index
      %c0_18 = arith.constant 0 : index
      %c0_19 = arith.constant 0 : index
      %19 = vector.load %arg3[%c2, %c0_18, %c0_19] : memref<4x16x32xbf16, #tpu.memory_space<vmem>>, vector<1x16x32xbf16>
      %20 = vector.shape_cast %19 : vector<1x16x32xbf16> to vector<16x32xbf16>
      %c32_20 = arith.constant 32 : index
      %c64 = arith.constant 64 : index
      %21 = vector.load %arg6[%c32_20, %c64] : memref<64x128xbf16, #tpu.memory_space<vmem>>, vector<16x32xbf16>
      tpu.vector_store %arg6[%c32_20, %c64], %20 {strides = array<i32>} : memref<64x128xbf16, #tpu.memory_space<vmem>>, vector<16x32xbf16>,
      %c3 = arith.constant 3 : index
      %c0_21 = arith.constant 0 : index
      %c0_22 = arith.constant 0 : index
      %22 = vector.load %arg3[%c3, %c0_21, %c0_22] : memref<4x16x32xbf16, #tpu.memory_space<vmem>>, vector<1x16x32xbf16>
      %23 = vector.shape_cast %22 : vector<1x16x32xbf16> to vector<16x32xbf16>
      %c48 = arith.constant 48 : index
      %c96 = arith.constant 96 : index
      %24 = vector.load %arg6[%c48, %c96] : memref<64x128xbf16, #tpu.memory_space<vmem>>, vector<16x32xbf16>
      tpu.vector_store %arg6[%c48, %c96], %23 {strides = array<i32>} : memref<64x128xbf16, #tpu.memory_space<vmem>>, vector<16x32xbf16>,
    } else {
    }
    %c0 = arith.constant 0 : index
    %c0_1 = arith.constant 0 : index
    %3 = vector.load %arg6[%c0, %c0_1] : memref<64x128xbf16, #tpu.memory_space<vmem>>, vector<64x128xbf16>
    %c0_2 = arith.constant 0 : index
    %c0_3 = arith.constant 0 : index
    %4 = vector.load %arg2[%c0_2, %c0_3] : memref<8x64xbf16, #tpu.memory_space<vmem>>, vector<8x64xbf16>
    %cst = arith.constant dense<0.000000e+00> : vector<8x128xf32>
    %5 = tpu.matmul %4, %3, %cst {dimension_numbers = #tpu.dot_dimension_numbers<[1], [0], [0], [1], [0, 0, 1, 1], [], []>} : vector<8x64xbf16>, vector<64x128xbf16>, vector<8x128xf32> -> vector<8x128xf32>
    %c0_4 = arith.constant 0 : index
    %c0_5 = arith.constant 0 : index
    %6 = vector.load %arg4[%c0_4, %c0_5] : memref<1x128xbf16, #tpu.memory_space<vmem>>, vector<1x128xbf16>
    %7 = arith.extf %6 : vector<1x128xbf16> to vector<1x128xf32>
    %8 = vector.broadcast %7 : vector<1x128xf32> to vector<8x128xf32>
    %9 = arith.addf %5, %8 : vector<8x128xf32>
    %c0_6 = arith.constant 0 : index
    %c0_7 = arith.constant 0 : index
    %10 = vector.load %arg5[%c0_6, %c0_7] : memref<8x128xf32, #tpu.memory_space<vmem>>, vector<8x128xf32>
    tpu.vector_store %arg5[%c0_6, %c0_7], %9 {strides = array<i32>} : memref<8x128xf32, #tpu.memory_space<vmem>>, vector<8x128xf32>,
    return
  }
  func.func @transform_0(%arg0: i32, %arg1: i32) -> (i32, i32) {
    %c0_i32 = arith.constant 0 : i32
    return %arg1, %arg0 : i32, i32
  }
  func.func @transform_1(%arg0: i32, %arg1: i32) -> (i32, i32, i32) {
    %c0_i32 = arith.constant 0 : i32
    %c0_i32_0 = arith.constant 0 : i32
    %c0_i32_1 = arith.constant 0 : i32
    return %arg0, %c0_i32, %c0_i32_0 : i32, i32, i32
  }
  func.func @transform_2(%arg0: i32, %arg1: i32) -> (i32, i32) {
    %c0_i32 = arith.constant 0 : i32
    %c0_i32_0 = arith.constant 0 : i32
    return %c0_i32, %arg0 : i32, i32
  }
  func.func @transform_3(%arg0: i32, %arg1: i32) -> (i32, i32) {
    %c0_i32 = arith.constant 0 : i32
    return %arg1, %arg0 : i32, i32
  }
}

</mosaic_0001>

<bundles_post_ra>
// kernel: tpu_custom_call.1
= control target key start
LH: loop header
LB: loop body
LE: loop exit
PB: predicated region body
PF: predicated region fallthrough
CT: control target
= control target key end

     0   :  { %8 = vsyncpa [#allocation4], 0  ;;  %s355_s0 = inlined_call_operand.hbm [shape: bf16[8,64], index: 0, kind: input, shape index: {}]   ;;  %s356_s1 = inlined_call_operand.hbm [shape: bf16[4,16,32], index: 1, kind: input, shape index: {}]   ;;  %s357_s2 = inlined_call_operand.vmem [shape: bf16[1,128], index: 2, kind: input, shape index: {}]   ;;  %s358_s3 = inlined_call_operand.hbm [shape: f32[8,128], index: 3, kind: output, shape index: {}]  }
   0x1   :  { %9 = vsyncpa [#allocation7], 0 }
   0x2   :  { %10 = vsyncpa [#allocation5], 0  ;;  %s279_s12 = smov [#allocation3]   ;;  %s280_s14 = smov [#allocation6]  }
   0x3   :  { %s17_s13 = sshll.u32 %s279_s12, 4  ;;  %s26_s15 = sshll.u32 %s280_s14, 4  ;;  %s18_s13 = int_to_ptr.vmem [resolvable:$true] %s17_s13  ;;  %s309_s15 = int_to_ptr.vmem [resolvable:$true] %s26_s15 }
   0x4   :  { %s207_s18 = scalar_lea.hbm %s355_s0, 64 }
   0x5   :  { %p208_p0 = scmp.ne.s32.totalorder %s355_s0, %s207_s18  ;;  %p211_p1 = scmp.lt.u32.totalorder %s207_s18, %s355_s0 }
   0x7   :  { %p213_p2 = pnand %p211_p1, %p208_p0 }
   0x9   :  { %216 = shalt.err (!%p213_p2)
}
   0xa   :  { %s217_s23 = scalar_lea.vmem %s18_s13, 64  ;;  %p222_p4 = scmp.lt.s32.totalorder %s18_s13, %s18_s13 }
   0xb   :  { %p218_p3 = scmp.ne.s32.totalorder %s18_s13, %s217_s23  ;;  %p223_p5 = scmp.lt.s32.totalorder %s217_s23, %s217_s23 }
   0xd   :  { %p224_p6 = por %p223_p5, %p222_p4 }
   0xf   :  { %p225_p7 = pnand %p224_p6, %p218_p3 }
  0x11   :  { %228 = shalt.err (!%p225_p7)
}
  0x12   :  { %20 = dma.hbm_to_vmem [thread:$0]  %s355_s0, 64, %s18_s13, [#allocation4]  }
  0x13   :  { %s229_s28 = scalar_lea.hbm %s356_s1, 512 }
  0x14   :  { %p230_p8 = scmp.ne.s32.totalorder %s356_s1, %s229_s28  ;;  %p233_p9 = scmp.lt.u32.totalorder %s229_s28, %s356_s1 }
  0x16   :  { %p235_p10 = pnand %p233_p9, %p230_p8 }
  0x18   :  { %238 = shalt.err (!%p235_p10)
}
  0x19   :  { %s239_s6 = scalar_lea.vmem %s309_s15, 512  ;;  %p244_p12 = scmp.lt.s32.totalorder %s309_s15, %s309_s15 }
  0x1a   :  { %p240_p11 = scmp.ne.s32.totalorder %s309_s15, %s239_s6  ;;  %p245_p13 = scmp.lt.s32.totalorder %s239_s6, %s239_s6 }
  0x1c   :  { %p246_p0 = por %p245_p13, %p244_p12 }
  0x1e   :  { %p247_p1 = pnand %p246_p0, %p240_p11 }
  0x20   :  { %250 = shalt.err (!%p247_p1)
}
  0x21   :  { %s281_s0 = smov 64   ;;  %s282_s7 = smov 4  }
  0x22   :  { %32 = dma.hbm_to_vmem [thread:$0]  %s356_s1, 512, %s309_s15, [#allocation7], %s281_s0, %s281_s0, %s282_s7  }
  0x23   :  { %273 = dma.done.wait [#allocation4], 64  }
  0x24   :  { %274 = vsyncadd [#allocation4], 4294967232 }
  0x25   :  { %275 = dma.done.wait [#allocation7], 512  }
  0x26   :  { %276 = vsyncadd [#allocation7], 4294966784  ;;  %v283_v0 = vmov 0   ;;  %v284_v1 = vmov 0.0   ;;  %v203_v2 = vld [vmem:[#allocation6 + $0x8] sm:$0xff]   ;;  %v204_v3 = vld [vmem:[#allocation6 + $0x10] sm:$0xff]   ;;  %v106_v14 = vlaneseq }
  0x27   :  { %46 = vst [vmem:[#allocation2] sm:$0xff] %v283_v0  ;;  %47 = vst [vmem:[#allocation2 + $0x8] sm:$0xff] %v283_v0  ;;  %181 = vmatprep.subr.bf16.mxu0 %v284_v1  ;;  %s285_s10 = smov 32   ;;  %v205_v4 = vld [vmem:[#allocation6 + $0x18] sm:$0xff]   ;;  %vm58_vm0 = vcmask 261120   ;;  %v206_v5 = vld [vmem:[#allocation6] sm:$0xff]  }
  0x28   :  { %48 = vst [vmem:[#allocation2 + $0x10] sm:$0xff] %v283_v0  ;;  %49 = vst [vmem:[#allocation2 + $0x18] sm:$0xff] %v283_v0  ;;  %68 = vrot.lane.b32.xlu0 %v203_v2, %s285_s10  ;;  %s286_s11 = smov 96   ;;  %vm287_vm1 = vmmov 0   ;;  %vm71_vm2 = vcmask 523520   ;;  %vm97_vm3 = vcmask 1048320  }
  0x29   :  { %94 = vrot.lane.b32.xlu1 %v205_v4, %s286_s11  ;;  %59 = vst.msk [vmem:[#allocation2] sm:$0xff] %vm58_vm0, %v206_v5  ;;  %189 = vmatprep.mubr.msk.bf16.mxu0 %vm287_vm1, %v284_v1  ;;  %vm84_vm4 = vcmask 785920   ;;  %v103_v13 = vld [vmem:[#allocation3] sm:$0xf]  ;;  %vm110_vm5 = vcmask 523264   ;;  %v107_v15 = vshrl.u32 %v106_v14, 7 }
  0x2a   :  { %v104_v16 = vld [vmem:[%s357_s2] sm:$0x1]  ;;  %s288_s13 = smov [#allocation8]  }
  0x2b   :  { %v105_v17 = vunpack.c.l.bf16 %v104_v16  ;;  %v108_v18 = vsub.s32 0, %v107_v15  ;;  %s161_s14 = sshll.u32 %s288_s13, 4  ;;  %s162_s14 = int_to_ptr.vmem [resolvable:$true] %s161_s14 }
  0x2c   :  { %81 = vrot.lane.b32.xlu0 %v204_v3, %s281_s0  ;;  %s251_s15 = scalar_lea.vmem %s162_s14, 128  ;;  %p256_p3 = scmp.lt.s32.totalorder %s162_s14, %s162_s14 }
  0x2d   :  { %v109_v19 = vrot.slane %v105_v17, %v108_v18  ;;  %p252_p2 = scmp.ne.s32.totalorder %s162_s14, %s251_s15  ;;  %p257_p4 = scmp.lt.s32.totalorder %s251_s15, %s251_s15 }
  0x2f   :  { %p258_p5 = por %p257_p4, %p256_p3 }
  0x30   :  { %v99_v6 = vld [vmem:[#allocation2] sm:$0xff] }
  0x31   :  { %182 = vmatpush3.bf16.msra.mxu0 %v99_v6  ;;  %p259_p6 = pnand %p258_p5, %p252_p2 }
  0x32   :  { %183 = vmatprep.subr.bf16.mxu0 %v284_v1 }
  0x9a   :  { %v69_v7 = vpop.permute.xlu0 %68 }
  0x9b   :  { %72 = vst.msk [vmem:[#allocation2 + $0x8] sm:$0xff] %vm71_vm2, %v69_v7  ;;  %v95_v8 = vpop.permute.xlu1 %94 }
  0x9c   :  { %98 = vst.msk [vmem:[#allocation2 + $0x18] sm:$0xff] %vm97_vm3, %v95_v8 }
  0x9e   :  { %v82_v9 = vpop.permute.xlu0 %81 }
  0x9f   :  { %85 = vst.msk [vmem:[#allocation2 + $0x10] sm:$0xff] %vm84_vm4, %v82_v9 }
  0xa2   :  { %v100_v10 = vld [vmem:[#allocation2 + $0x8] sm:$0xff] }
  0xa3   :  { %184 = vmatpush3.bf16.msra.mxu0 %v100_v10  ;;  %v102_v12 = vld [vmem:[#allocation2 + $0x18] sm:$0xff] }
  0xa4   :  { %185 = vmatprep.subr.bf16.mxu0 %v284_v1 }
  0xa6   :  { %v101_v11 = vld [vmem:[#allocation2 + $0x10] sm:$0xff] }
  0xa7   :  { %186 = vmatpush3.bf16.msra.mxu0 %v101_v11 }
  0xa8   :  { %187 = vmatprep.subr.bf16.mxu0 %v284_v1 }
  0xab   :  { %188 = vmatpush3.bf16.msra.mxu0 %v102_v12 }
  0xae   :  { %190 = vmatmul.mubr.msk.bf16.vlgmr.msra.gmra.mrb[0].mxu0 %vm110_vm5, %v103_v13 }
 0x181   :  { %v148_v20 = vpop.f32.mrb[0].mxu0 }
 0x182   :  { %v149_v21 = vadd.f32 %v148_v20, %v109_v19  ;;  %v191_v22 = vpop.f32.mrb[1].mxu0 }
 0x183   :  { %v151_v23 = vpop.f32.mrb[2].mxu0 }
 0x184   :  { %154 = vst [vmem:[#allocation8] sm:$0xff] %v149_v21  ;;  %v192_v24 = vpop.f32.mrb[3].mxu0 }
 0x185   :  { %262 = shalt.err (!%p259_p6)
}
 0x186   :  { %s263_s17 = scalar_lea.hbm %s358_s3, 128 }
 0x187   :  { %p264_p7 = scmp.ne.s32.totalorder %s358_s3, %s263_s17  ;;  %p267_p8 = scmp.lt.u32.totalorder %s263_s17, %s358_s3 }
 0x189   :  { %p269_p9 = pnand %p267_p8, %p264_p7 }
 0x18b   :  { %272 = shalt.err (!%p269_p9)
}
 0x18c   :  { %164 = dma.vmem_to_hbm [thread:$0]  %s162_s14, 128, %s358_s3, [#allocation5]  }
 0x18d   :  { %277 = dma.done.wait [#allocation5], 128  }
 0x18e   :  { %278 = vsyncadd [#allocation5], 4294967168 }
 0x18f   :  { %168 = vsyncpa [#allocation4], 1 }
 0x190   :  { %169 = vsyncpa [#allocation7], 1 }
 0x191   :  { %170 = vsyncpa [#allocation5], 1 }

</bundles_post_ra>
